<compile_context>
chip_gen: v5e
topology: v5e:2x2
jax: 0.10.0
libtpu: 0.0.40
codegen_flags: <defaults>
</compile_context>

<pallas_src>
import functools
import math

import jax
import jax.numpy as jnp
from jax.experimental import pallas as pl
from jax.experimental.pallas import tpu as pltpu

LANES = 128            # full-width last dim -> lane-dense, unmasked vst streams
MIN_BLOCK_ROWS = 2048  # 1 MiB f32 per block: per-step overhead < ~20%
MAX_BLOCK_ROWS = 8192  # 4 MiB f32 per block
TARGET_BLOCKS = 8      # keep >= ~8 blocks for pipelining + v7x megacore sharding
VMEM_LIMIT_BYTES = 32 * 1024 * 1024  # fits 8192-row blocks double-buffered on v5e/v6e/v7x


def _cdiv(a, b):
    return -(-a // b)


def _round_up(a, b):
    return _cdiv(a, b) * b


def _choose_block_rows(rows):
    """Pick block_rows: big enough to amortize per-step overhead, small enough
    to give multiple blocks (pipelining / both v7x TensorCores) on large arrays."""
    if rows <= MIN_BLOCK_ROWS:
        return rows  # single full-extent block (exempt from (8,128)/(32,128) tiling rules)
    br = _round_up(_cdiv(rows, TARGET_BLOCKS), 32)  # multiple of 32: int8/bool sublane tile
    return max(MIN_BLOCK_ROWS, min(br, MAX_BLOCK_ROWS))


def _plan(total):
    """Static layout of the flat slab: (rows, LANES) with (block_rows, LANES) blocks."""
    rows = _cdiv(total, LANES)
    padded_total = rows * LANES       # == total whenever total % 128 == 0 (no pad/copy)
    block_rows = _choose_block_rows(rows)
    return rows, block_rows, padded_total


# ---------------------------------------------------------------------------
# Kernels
# ---------------------------------------------------------------------------
def _linear_trace_kernel(x_ref, trace_ref, scalars_ref, out_ref):
    # trace_new = trace * tau_t + alpha_t * f32(x)   (elementwise, VPU)
    alpha_t = scalars_ref[0]  # SMEM scalar
    tau_t = scalars_ref[1]    # SMEM scalar
    out_ref[...] = trace_ref[...] * tau_t + x_ref[...].astype(jnp.float32) * alpha_t


def _linear_trace_seq_kernel(x_ref, trace0_ref, scalars_ref, out_ref, acc_ref):
    # grid = (num_blocks, T); T is the innermost ("arbitrary") axis, so the trace
    # accumulator stays resident in VMEM across the whole sequence for each block.
    t = pl.program_id(1)

    @pl.when(t == 0)
    def _():
        acc_ref[...] = trace0_ref[...]

    alpha_t = scalars_ref[0]
    tau_t = scalars_ref[1]
    new = acc_ref[...] * tau_t + x_ref[...].astype(jnp.float32) * alpha_t
    acc_ref[...] = new
    out_ref[...] = new


# ---------------------------------------------------------------------------
# Bool-ref support probe (fallback keeps correctness if Mosaic rejects i1 refs)
# ---------------------------------------------------------------------------
@functools.lru_cache(maxsize=None)
def _bool_spikes_ok():
    try:
        x = jnp.zeros((64, LANES), jnp.bool_)
        t = jnp.zeros((64, LANES), jnp.float32)
        s = jnp.array([1.0, 1.0], jnp.float32)
        out = pl.pallas_call(
            _linear_trace_kernel,
            out_shape=jax.ShapeDtypeStruct((64, LANES), jnp.float32),
            grid=(2,),
            in_specs=[
                pl.BlockSpec((32, LANES), lambda i: (i, 0)),
                pl.BlockSpec((32, LANES), lambda i: (i, 0)),
                pl.BlockSpec(memory_space=pltpu.MemorySpace.SMEM),
            ],
            out_specs=pl.BlockSpec((32, LANES), lambda i: (i, 0)),
        )(x, t, s)
        jax.block_until_ready(out)
        return True
    except Exception:
        return False


def _prep_spikes(x):
    if x.dtype == jnp.bool_ and not _bool_spikes_ok():
        # TODO(synk): fallback path only; adds one extra ~2 B/elem HBM pass when
        # this Mosaic build rejects i1 refs.
        return x.astype(jnp.uint8)
    return x


# ---------------------------------------------------------------------------
# Wrappers
# ---------------------------------------------------------------------------
@jax.jit
def _trace_update_pallas(x, trace, scalars):
    """x: spike tensor (bool or uint8) of cells_shape; trace: f32 cells_shape;
    scalars: f32[2] = [alpha_t, tau_t]. Returns the new trace (f32, cells_shape)."""
    cells_shape = trace.shape
    total = math.prod(cells_shape)
    rows, block_rows, padded_total = _plan(total)

    x_flat = x.reshape(-1)
    t_flat = trace.reshape(-1)
    if padded_total != total:  # only when total % 128 != 0 (rare)
        pad = (0, padded_total - total)
        x_flat = jnp.pad(x_flat, pad)
        t_flat = jnp.pad(t_flat, pad)
    x2 = x_flat.reshape(rows, LANES)
    t2 = t_flat.reshape(rows, LANES)

    new2 = pl.pallas_call(
        _linear_trace_kernel,
        out_shape=jax.ShapeDtypeStruct((rows, LANES), jnp.float32),
        grid=(pl.cdiv(rows, block_rows),),  # ragged final block is masked by Pallas
        in_specs=[
            pl.BlockSpec((block_rows, LANES), lambda i: (i, 0)),  # spikes
            pl.BlockSpec((block_rows, LANES), lambda i: (i, 0)),  # trace (f32)
            pl.BlockSpec(memory_space=pltpu.MemorySpace.SMEM),    # [alpha_t, tau_t]
        ],
        out_specs=pl.BlockSpec((block_rows, LANES), lambda i: (i, 0)),
        compiler_params=pltpu.CompilerParams(
            dimension_semantics=("parallel",),       # megacore sharding on v7x
            vmem_limit_bytes=VMEM_LIMIT_BYTES,
        ),
    )(x2, t2, scalars)

    new_flat = new2.reshape(-1)
    if padded_total != total:
        new_flat = new_flat[:total]
    return new_flat.reshape(cells_shape)


@jax.jit
def _trace_update_sequence_pallas(xs, trace, scalars):
    """Time-batched update. xs: (T, *cells_shape) spikes; trace: f32 cells_shape.
    Returns (T, *cells_shape) f32 traces (trace after each step)."""
    T = xs.shape[0]
    cells_shape = trace.shape
    total = math.prod(cells_shape)
    rows, block_rows, padded_total = _plan(total)

    xs_flat = xs.reshape(T, -1)
    t_flat = trace.reshape(-1)
    if padded_total != total:
        xs_flat = jnp.pad(xs_flat, ((0, 0), (0, padded_total - total)))
        t_flat = jnp.pad(t_flat, (0, padded_total - total))
    xs3 = xs_flat.reshape(T, rows, LANES)
    t3 = t_flat.reshape(1, rows, LANES)

    out3 = pl.pallas_call(
        _linear_trace_seq_kernel,
        out_shape=jax.ShapeDtypeStruct((T, rows, LANES), jnp.float32),
        grid=(pl.cdiv(rows, block_rows), T),
        in_specs=[
            pl.BlockSpec((1, block_rows, LANES), lambda i, t: (t, i, 0)),  # spike frame t
            pl.BlockSpec((1, block_rows, LANES), lambda i, t: (0, i, 0)),  # initial trace
            pl.BlockSpec(memory_space=pltpu.MemorySpace.SMEM),             # [alpha_t, tau_t]
        ],
        out_specs=pl.BlockSpec((1, block_rows, LANES), lambda i, t: (t, i, 0)),
        scratch_shapes=[pltpu.VMEM((1, block_rows, LANES), jnp.float32)],  # resident trace
        compiler_params=pltpu.CompilerParams(
            dimension_semantics=("parallel", "arbitrary"),
            vmem_limit_bytes=VMEM_LIMIT_BYTES,
        ),
    )(xs3, t3, scalars)

    out_flat = out3.reshape(T, -1)
    if padded_total != total:
        out_flat = out_flat[:, :total]
    return out_flat.reshape((T,) + cells_shape)


# ---------------------------------------------------------------------------
# Module
# ---------------------------------------------------------------------------
class InputNeuron:
    """JAX/Pallas port of the PyTorch `Input` module (linear trace update)."""

    def __init__(self, cells_shape, dt, alpha_t, tau_t, update_type="linear"):
        if update_type != "linear":
            # TODO(synk): exponential_trace_update not wired up (module default is linear).
            raise ValueError("Only 'linear' update_type implemented")
        assert 0.0 <= tau_t <= 1.0, "Decays for linear updates should be in [0, 1]."
        self.cells_shape = tuple(cells_shape)
        self.dt = jnp.float32(dt)          # unused by the linear update (matches PySNN)
        self.alpha_t = jnp.float32(alpha_t)
        self.tau_t = jnp.float32(tau_t)
        # The PyTorch buffers are scalars broadcast to cells_shape; carried as two
        # SMEM scalars instead of two full-size HBM arrays.
        self._scalars = jnp.array([alpha_t, tau_t], dtype=jnp.float32)
        self.reset_state()

    def reset_state(self):
        self.trace = jnp.zeros(self.cells_shape, dtype=jnp.float32)
        self.spikes = jnp.zeros(self.cells_shape, dtype=jnp.bool_)

    def forward(self, x):
        """x: bool spike tensor of shape cells_shape. Returns (x, trace)."""
        x = jnp.asarray(x)
        self.trace = _trace_update_pallas(_prep_spikes(x), self.trace, self._scalars)
        self.spikes = x if x.dtype == jnp.bool_ else x.astype(jnp.bool_)  # spikes.copy_(x)
        return x, self.trace

    __call__ = forward

    def forward_sequence(self, xs):
        """Time-batched equivalent of calling forward() once per frame of xs
        (shape (T, *cells_shape)). Returns (xs, traces) with traces[t] equal to
        the trace after step t; module state ends identical to T forward calls."""
        xs = jnp.asarray(xs)
        traces = _trace_update_sequence_pallas(_prep_spikes(xs), self.trace, self._scalars)
        self.trace = traces[-1]
        last = xs[-1]
        self.spikes = last if last.dtype == jnp.bool_ else last.astype(jnp.bool_)
        return xs, traces


def _reference_forward(x, trace, alpha_t, tau_t):
    return trace * tau_t + alpha_t * x.astype(jnp.float32)


if __name__ == "__main__":
    # cells_shape in PyTorch format with batch first: (B, C, H, W)
    cells_shape = (2, 4, 16, 16)
    dt, alpha_t, tau_t = 1.0, 0.5, 0.8

    neuron = InputNeuron(cells_shape, dt, alpha_t, tau_t, update_type="linear")

    key = jax.random.PRNGKey(0)
    k1, k2, k3 = jax.random.split(key, 3)
    x1 = jax.random.bernoulli(k1, p=0.3, shape=cells_shape)
    x2 = jax.random.bernoulli(k2, p=0.3, shape=cells_shape)

    # step 1 and step 2 (trace accumulates over time)
    spikes1, trace1 = neuron(x1)
    spikes2, trace2 = neuron(x2)
    jax.block_until_ready(trace2)

    ref1 = _reference_forward(x1, jnp.zeros(cells_shape, jnp.float32), alpha_t, tau_t)
    ref2 = _reference_forward(x2, ref1, alpha_t, tau_t)

    assert trace1.shape == cells_shape and trace1.dtype == jnp.float32
    assert spikes2.dtype == jnp.bool_ and bool(jnp.all(spikes2 == x2))
    assert bool(jnp.allclose(trace1, ref1, atol=1e-6))
    assert bool(jnp.allclose(trace2, ref2, atol=1e-6))

    # Non-multiple-of-128 shape: exercises the (rare) padded path.
    odd_shape = (3, 5, 7, 11)
    n_odd = InputNeuron(odd_shape, dt, 0.25, 0.5)
    xo = jax.random.bernoulli(k1, p=0.5, shape=odd_shape)
    _, to = n_odd(xo)
    refo = _reference_forward(xo, jnp.zeros(odd_shape, jnp.float32), 0.25, 0.5)
    assert bool(jnp.allclose(to, refo, atol=1e-6))

    # Larger shape: exercises the multi-block pipelined grid with a ragged
    # (masked) final block: 655360 cells -> 5120 rows -> blocks of 2048 rows.
    big_shape = (5, 4, 256, 128)
    n_big = InputNeuron(big_shape, dt, alpha_t, tau_t)
    xb = jax.random.bernoulli(k2, p=0.1, shape=big_shape)
    _, tb1 = n_big(xb)
    _, tb2 = n_big(xb)
    jax.block_until_ready(tb2)
    refb1 = _reference_forward(xb, jnp.zeros(big_shape, jnp.float32), alpha_t, tau_t)
    refb2 = _reference_forward(xb, refb1, alpha_t, tau_t)
    assert bool(jnp.allclose(tb1, refb1, atol=1e-6))
    assert bool(jnp.allclose(tb2, refb2, atol=1e-6))

    # Time-batched path: must match stepping forward() T times exactly.
    T = 5
    xs = jax.random.bernoulli(k3, p=0.25, shape=(T,) + cells_shape)
    n_seq = InputNeuron(cells_shape, dt, alpha_t, tau_t)
    _, traces_seq = n_seq.forward_sequence(xs)
    n_loop = InputNeuron(cells_shape, dt, alpha_t, tau_t)
    traces_loop = []
    for t in range(T):
        _, tr = n_loop(xs[t])
        traces_loop.append(tr)
    traces_loop = jnp.stack(traces_loop)
    jax.block_until_ready(traces_seq)
    assert bool(jnp.allclose(traces_seq, traces_loop, atol=1e-6))
    assert bool(jnp.allclose(n_seq.trace, n_loop.trace, atol=1e-6))
    assert bool(jnp.all(n_seq.spikes == xs[-1]))

    print("KERNEL_OK")
</pallas_src>

<mosaic_0001>
module attributes {stable_mosaic.version = 11 : i64} {
  func.func @_linear_trace_kernel(%arg0: i32, %arg1: memref<32x128xi32, #tpu.memory_space<vmem>>, %arg2: memref<32x128xf32, #tpu.memory_space<vmem>>, %arg3: memref<2xf32, #tpu.memory_space<smem>>, %arg4: memref<32x128xf32, #tpu.memory_space<vmem>>) attributes {dimension_semantics = [#tpu.dimension_semantics<arbitrary>], iteration_bounds = array<i64: 2>, scalar_prefetch = 0 : i64, scratch_operands = 0 : i64, tpu.core_type = #tpu.core_type<tc>, window_params = [{transform_indices = @transform_0, window_bounds = array<i64: 32, 128>}, {transform_indices = @transform_1, window_bounds = array<i64: 32, 128>}, {transform_indices = @transform_2, window_bounds = array<i64: 2>}, {transform_indices = @transform_3, window_bounds = array<i64: 32, 128>}]} {
    %c0 = arith.constant 0 : index
    %0 = memref.load %arg3[%c0] : memref<2xf32, #tpu.memory_space<smem>>
    %c1 = arith.constant 1 : index
    %1 = memref.load %arg3[%c1] : memref<2xf32, #tpu.memory_space<smem>>
    %c0_0 = arith.constant 0 : index
    %c0_1 = arith.constant 0 : index
    %2 = vector.load %arg2[%c0_0, %c0_1] : memref<32x128xf32, #tpu.memory_space<vmem>>, vector<32x128xf32>
    %3 = vector.broadcast %1 : f32 to vector<32x128xf32>
    %4 = arith.mulf %2, %3 : vector<32x128xf32>
    %c0_2 = arith.constant 0 : index
    %c0_3 = arith.constant 0 : index
    %5 = vector.load %arg1[%c0_2, %c0_3] : memref<32x128xi32, #tpu.memory_space<vmem>>, vector<32x128xi32>
    %cst = arith.constant dense<0> : vector<32x128xi32>
    %6 = arith.cmpi ne, %5, %cst : vector<32x128xi32>
    %7 = arith.extui %6 : vector<32x128xi1> to vector<32x128xi32>
    %8 = arith.sitofp %7 : vector<32x128xi32> to vector<32x128xf32>
    %9 = vector.broadcast %0 : f32 to vector<32x128xf32>
    %10 = arith.mulf %8, %9 : vector<32x128xf32>
    %11 = arith.addf %4, %10 : vector<32x128xf32>
    %c0_4 = arith.constant 0 : index
    %c0_5 = arith.constant 0 : index
    %12 = vector.load %arg4[%c0_4, %c0_5] : memref<32x128xf32, #tpu.memory_space<vmem>>, vector<32x128xf32>
    tpu.vector_store %arg4[%c0_4, %c0_5], %11 {strides = array<i32>} : memref<32x128xf32, #tpu.memory_space<vmem>>, vector<32x128xf32>,
    return
  }
  func.func @transform_0(%arg0: i32) -> (i32, i32) {
    %c0_i32 = arith.constant 0 : i32
    %c0_i32_0 = arith.constant 0 : i32
    return %arg0, %c0_i32 : i32, i32
  }
  func.func @transform_1(%arg0: i32) -> (i32, i32) {
    %c0_i32 = arith.constant 0 : i32
    %c0_i32_0 = arith.constant 0 : i32
    return %arg0, %c0_i32 : i32, i32
  }
  func.func @transform_2(%arg0: i32) -> i32 {
    %c0_i32 = arith.constant 0 : i32
    %c0_i32_0 = arith.constant 0 : i32
    return %c0_i32 : i32
  }
  func.func @transform_3(%arg0: i32) -> (i32, i32) {
    %c0_i32 = arith.constant 0 : i32
    %c0_i32_0 = arith.constant 0 : i32
    return %arg0, %c0_i32 : i32, i32
  }
}

module attributes {stable_mosaic.version = 11 : i64} {
  func.func @_linear_trace_kernel(%arg0: i32, %arg1: memref<16x128xi8, #tpu.memory_space<vmem>>, %arg2: memref<16x128xf32, #tpu.memory_space<vmem>>, %arg3: memref<2xf32, #tpu.memory_space<smem>>, %arg4: memref<16x128xf32, #tpu.memory_space<vmem>>) attributes {dimension_semantics = [#tpu.dimension_semantics<parallel>], iteration_bounds = array<i64: 1>, scalar_prefetch = 0 : i64, scratch_operands = 0 : i64, tpu.core_type = #tpu.core_type<tc>, window_params = [{transform_indices = @transform_0, window_bounds = array<i64: 16, 128>}, {transform_indices = @transform_1, window_bounds = array<i64: 16, 128>}, {transform_indices = @transform_2, window_bounds = array<i64: 2>}, {transform_indices = @transform_3, window_bounds = array<i64: 16, 128>}]} {
    %c0 = arith.constant 0 : index
    %0 = memref.load %arg3[%c0] : memref<2xf32, #tpu.memory_space<smem>>
    %c1 = arith.constant 1 : index
    %1 = memref.load %arg3[%c1] : memref<2xf32, #tpu.memory_space<smem>>
    %c0_0 = arith.constant 0 : index
    %c0_1 = arith.constant 0 : index
    %2 = vector.load %arg2[%c0_0, %c0_1] : memref<16x128xf32, #tpu.memory_space<vmem>>, vector<16x128xf32>
    %3 = vector.broadcast %1 : f32 to vector<16x128xf32>
    %4 = arith.mulf %2, %3 : vector<16x128xf32>
    %c0_2 = arith.constant 0 : index
    %c0_3 = arith.constant 0 : index
    %5 = vector.load %arg1[%c0_2, %c0_3] : memref<16x128xi8, #tpu.memory_space<vmem>>, vector<16x128xi8>
    %6 = arith.uitofp %5 : vector<16x128xi8> to vector<16x128xf32>
    %7 = vector.broadcast %0 : f32 to vector<16x128xf32>
    %8 = arith.mulf %6, %7 : vector<16x128xf32>
    %9 = arith.addf %4, %8 : vector<16x128xf32>
    %c0_4 = arith.constant 0 : index
    %c0_5 = arith.constant 0 : index
    %10 = vector.load %arg4[%c0_4, %c0_5] : memref<16x128xf32, #tpu.memory_space<vmem>>, vector<16x128xf32>
    tpu.vector_store %arg4[%c0_4, %c0_5], %9 {strides = array<i32>} : memref<16x128xf32, #tpu.memory_space<vmem>>, vector<16x128xf32>,
    return
  }
  func.func @transform_0(%arg0: i32) -> (i32, i32) {
    %c0_i32 = arith.constant 0 : i32
    %c0_i32_0 = arith.constant 0 : i32
    return %arg0, %c0_i32 : i32, i32
  }
  func.func @transform_1(%arg0: i32) -> (i32, i32) {
    %c0_i32 = arith.constant 0 : i32
    %c0_i32_0 = arith.constant 0 : i32
    return %arg0, %c0_i32 : i32, i32
  }
  func.func @transform_2(%arg0: i32) -> i32 {
    %c0_i32 = arith.constant 0 : i32
    %c0_i32_0 = arith.constant 0 : i32
    return %c0_i32 : i32
  }
  func.func @transform_3(%arg0: i32) -> (i32, i32) {
    %c0_i32 = arith.constant 0 : i32
    %c0_i32_0 = arith.constant 0 : i32
    return %arg0, %c0_i32 : i32, i32
  }
}

</mosaic_0001>

<bundles_post_ra>
// kernel: tpu_custom_call.1
= control target key start
LH: loop header
LB: loop body
LE: loop exit
PB: predicated region body
PF: predicated region fallthrough
CT: control target
= control target key end

     0   :  { %8 = vsyncpa [#allocation4], 0  ;;  %s627_s0 = inlined_call_operand.vmem [shape: s32[64,128], index: 0, kind: input, shape index: {}]   ;;  %s628_s1 = inlined_call_operand.vmem [shape: f32[64,128], index: 1, kind: input, shape index: {}]   ;;  %s629_s2 = inlined_call_operand.vmem [shape: f32[2], index: 2, kind: input, shape index: {}]   ;;  %s630_s3 = inlined_call_operand.hbm [shape: f32[64,128], index: 3, kind: output, shape index: {}]  }
   0x1   :  { %9 = vsyncpa [#allocation3], 0 }
   0x2   :  { %11 = vsyncpa [#allocation3 + $0x1], 0  ;;  %s532_s12 = smov 0   ;;  %s534_s13 = smov 0  }
   0x3   :  { %s536_s14 = smov 0   ;;  %s538_s15 = smov 0  }
   0x4 LB: > { %s553_s16 = sadd.s32 4294967295, %s506_s15   ;;  %s350_s17 = sadd.s32 4294967294, %s506_s15   ;;  %s506_s15 = sphi %s538_s15, %s636_s15   ;;  %s502_s14 = sphi %s536_s14, %s635_s14   ;;  %s498_s13 = sphi %s534_s13, %s634_s13   ;;  %s494_s12 = sphi %s532_s12, %s633_s12  }
   0x5   : > { %s557_s18 = sadd.s32 1, %s506_s15   ;;  %s97_s19 = sadd.s32 1, %s502_s14 }
   0x6   : > { %s94_s20 = ssub.s32 %s506_s15, %s557_s18  ;;  %p107_p0 = scmp.ne.s32.totalorder %s502_s14, %s498_s13 }
   0x7   : > { %p95_p1 = scmp.eq.s32.totalorder %s94_s20, 0  ;;  %p108_p2 = scmp.eq.s32.totalorder %s553_s16, 1 }
   0x8   : > { %p113_p3 = scmp.ne.s32.totalorder %s498_s13, %s494_s12  ;;  %p114_p4 = scmp.eq.s32.totalorder %s350_s17, 1 }
   0x9   : > { %s568_s21 = scalar_select %p95_p1, %s502_s14, %s97_s19  }
   0xa   : > { %p570_p5 = por %p108_p2, %p107_p0  ;;  %p574_p6 = por %p114_p4, %p113_p3 }
   0xb   : > { %p351_p7 = scmp.ge.s32.totalorder %s506_s15, 1  ;;  %p121_p8 = scmp.lt.s32.totalorder %s506_s15, 3 }
   0xc   : > { %p386_p9 = scmp.eq.s32.totalorder %s553_s16, 0  ;;  %s133_s26 = sshll.u32 %s629_s2, 4  ;;  %s134_s26 = int_to_ptr.vmem [resolvable:$true] %s133_s26 }
   0xd   : > { %p122_p10 = pnand %p351_p7, %p121_p8  ;;  %s508_s27 = smov [#allocation2]  }
   0xf   : > { %p378_p11 = pneg %p122_p10  ;;  %164 = sbr.rel (%p122_p10) target bundleno = 44 (0x2c), region = 32 }
  0x11   : > { %p379_p12 = pnand %p386_p9, %p378_p11 }
  0x13   : > { %381 = dma.vmem_to_smem (!%p379_p12), %s134_s26, 16, %s508_s27, [#allocation4]  }
  0x14   : > { %485 = dma.done.wait (%p386_p9), [#allocation4], 16  }
  0x15   : > { %487 = vsyncadd (%p386_p9), [#allocation4], 4294967280 }
  0x16   : > { %171 = sfence }
  0x17   : > { %s357_s28 = sshll.u32 %s553_s16, 2  ;;  %s192_s29 = sand.u32 1, %s498_s13   ;;  %v509_v7 = vmov 0.0  }
  0x18   : > { %p196_p13 = scmp.lt.s32.totalorder %s357_s28, 7  ;;  %s208_s30 = sld [smem:[#allocation2]] }
  0x19   : > { %s361_s4 = sld [smem:[#allocation2 + $0x1]]  ;;  %s356_s5 = sshll.u32 %s192_s29, 5 }
  0x1a   : > { %s638_s28 = smov (!%p196_p13, %s357_s28), 7  ;;  %s371_s19 = sshll.u32 %s553_s16, 5 }
  0x1b   : > { %s358_s6 = sshll.u32 %s638_s28, 3  ;;  %s260_s25 = scalar_lea.hbm %s630_s3, %s371_s19 }
  0x1c   : > { %s199_s9 = scalar_lea.vmem %s627_s0, %s358_s6  ;;  %s205_s17 = scalar_lea.vmem %s628_s1, %s358_s6 }
  0x1d   : > { %v210_v0 = vld [vmem:[%s205_s17] sm:$0xff]  ;;  %v211_v2 = vld [vmem:[%s205_s17 + $0x8] sm:$0xff]  ;;  %v212_v5 = vld [vmem:[%s205_s17 + $0x10] sm:$0xff]  ;;  %s194_s16 = scalar_lea.vmem [#allocation5], %s356_s5  ;;  %s263_s27 = sshll.u32 %s260_s25, 4  ;;  %s264_s27 = int_to_ptr.hbm [resolvable:$true] %s263_s27 }
  0x1e   : > { %v219_v1 = vld [vmem:[%s199_s9] sm:$0xff]  ;;  %v235_v3 = vstv %s208_s30  ;;  %v220_v4 = vld [vmem:[%s199_s9 + $0x8] sm:$0xff]  ;;  %v221_v6 = vld [vmem:[%s199_s9 + $0x10] sm:$0xff]  ;;  %s261_s26 = sshll.u32 %s194_s16, 4  ;;  %s249_s28 = scalar_lea.sflag [#allocation3], %s192_s29  ;;  %s262_s26 = int_to_ptr.vmem [resolvable:$true] %s261_s26 }
  0x1f   : > { %vm223_vm0 = vcmp.ne.s32.totalorder %v219_v1, 0  ;;  %vm224_vm1 = vcmp.ne.s32.totalorder %v220_v4, 0  ;;  %vm225_vm2 = vcmp.ne.s32.totalorder %v221_v6, 0  ;;  %v213_v9 = vld [vmem:[%s205_s17 + $0x18] sm:$0xff]  ;;  %v214_v11 = vstv %s361_s4  ;;  %s454_s30 = sshra.s32 %s264_s27, 4  ;;  %s460_s7 = scalar_lea.hbm %s630_s3, 64  ;;  %s455_s30 = int_to_ptr.hbm [resolvable:$true] %s454_s30 }
  0x20   : > { %v362_v8 = vsel %vm223_vm0, 1.0, %v509_v7  ;;  %v222_v10 = vld [vmem:[%s199_s9 + $0x18] sm:$0xff]  ;;  %v363_v13 = vsel %vm224_vm1, 1.0, %v509_v7  ;;  %v364_v14 = vsel %vm225_vm2, 1.0, %v509_v7  ;;  %v215_v15 = vmul.f32 %v214_v11, %v210_v0  ;;  %s456_s4 = scalar_lea.hbm %s455_s30, 32  ;;  %p461_p3 = scmp.lt.s32.totalorder %s455_s30, %s630_s3 }
  0x21   : > { %v236_v12 = vmul.f32 %v362_v8, %v235_v3  ;;  %v216_v16 = vmul.f32 %v214_v11, %v211_v2  ;;  %v237_v17 = vmul.f32 %v363_v13, %v235_v3  ;;  %v217_v18 = vmul.f32 %v214_v11, %v212_v5  ;;  %p457_p0 = scmp.ne.s32.totalorder %s455_s30, %s456_s4  ;;  %p462_p4 = scmp.lt.s32.totalorder %s460_s7, %s456_s4 }
  0x22   : > { %v238_v19 = vmul.f32 %v364_v14, %v235_v3  ;;  %v218_v20 = vmul.f32 %v214_v11, %v213_v9  ;;  %vm226_vm3 = vcmp.ne.s32.totalorder %v222_v10, 0 }
  0x23   : > { %v240_v21 = vadd.f32 %v236_v12, %v215_v15  ;;  %v241_v22 = vadd.f32 %v237_v17, %v216_v16  ;;  %v365_v23 = vsel %vm226_vm3, 1.0, %v509_v7  ;;  %p458_p1 = pnand %p457_p0, %p570_p5  ;;  %p463_p7 = por %p462_p4, %p461_p3 }
  0x24   : > { %v242_v24 = vadd.f32 %v238_v19, %v217_v18  ;;  %v239_v25 = vmul.f32 %v365_v23, %v235_v3 }
  0x25   : > { %244 = vst [vmem:[%s194_s16] sm:$0xff] %v240_v21  ;;  %p459_p2 = pneg %p458_p1 }
  0x26   : > { %245 = vst [vmem:[%s194_s16 + $0x8] sm:$0xff] %v241_v22  ;;  %v243_v26 = vadd.f32 %v239_v25, %v218_v20 }
  0x27   : > { %246 = vst [vmem:[%s194_s16 + $0x10] sm:$0xff] %v242_v24  ;;  %p464_p8 = pnand %p463_p7, %p459_p2 }
  0x28   : > { %247 = vst [vmem:[%s194_s16 + $0x18] sm:$0xff] %v243_v26 }
  0x29   : > { %467 = shalt.err (!%p464_p8)
}
  0x2a   : > { %s510_s29 = smov 128   ;;  %s511_s10 = smov 8  }
  0x2b   : > { %376 = dma.vmem_to_hbm [thread:$0]  (%p570_p5), %s262_s26, 512, %s264_s27, %s249_s28, %s510_s29, %s510_s29, %s511_s10  }
  0x2c PF: > { %p388_p9 = scmp.ge.s32.totalorder %s506_s15, 2  ;;  %s278_s11 = sand.u32 1, %s494_s12  }
  0x2d   : > { %s279_s17 = scalar_lea.sflag [#allocation3], %s278_s11 }
  0x2e   : > { %p383_p10 = pnand %p388_p9, %p574_p6 }
  0x30   : > { %p384_p11 = pneg %p383_p10 }
  0x32   : > { %489 = dma.done.wait (%p384_p11), %s279_s17, 512  }
  0x33   : > { %491 = vsyncadd (%p384_p11), %s279_s17, 4294966784  ;;  %p14_p12 = scmp.ge.s32.totalorder %s557_s18, 4   ;;  %s633_s12 = smov %s498_s13 }
  0x34   : > { %s634_s13 = smov %s502_s14  ;;  %s635_s14 = smov %s568_s21 }
  0x35   : > { %s636_s15 = smov %s557_s18  ;;  %16 = sbr.rel (!%p14_p12) target bundleno = 4 (0x4), region = 75 }
  0x3a   :  { %285 = vsyncpa [#allocation3], 1 }
  0x3b   :  { %287 = vsyncpa [#allocation3 + $0x1], 1 }
  0x3c   :  { %288 = vsyncpa [#allocation4], 1 }
  0x3d   :  { %290 = vsyncpa [#allocation4 + $0x1], 1 }

// kernel: _trace_update_pallas.1
= control target key start
LH: loop header
LB: loop body
LE: loop exit
PB: predicated region body
PF: predicated region fallthrough
CT: control target
= control target key end

     0   :  { %8 = vsyncpa [#allocation3], 0  ;;  %s74_s15 = smov [#allocation2]   ;;  %s113_s0 = inlined_call_operand.vmem [shape: u8[16,128], index: 0, kind: input, shape index: {}]   ;;  %s114_s1 = inlined_call_operand.vmem [shape: f32[16,128], index: 1, kind: input, shape index: {}]   ;;  %s115_s2 = inlined_call_operand.vmem [shape: f32[2], index: 2, kind: input, shape index: {}]   ;;  %s116_s3 = inlined_call_operand.vmem [shape: f32[16,128], index: 3, kind: output, shape index: {}]  }
   0x1   :  { %s18_s14 = sshll.u32 %s115_s2, 4  ;;  %s19_s14 = int_to_ptr.vmem [resolvable:$true] %s18_s14 }
   0x2   :  { %21 = dma.vmem_to_smem %s19_s14, 16, %s74_s15, [#allocation3]  }
   0x3   :  { %72 = dma.done.wait [#allocation3], 16  }
   0x4   :  { %73 = vsyncadd [#allocation3], 4294967280 }
   0x5   :  { %26 = sfence }
   0x6   :  { %s27_s16 = sld [smem:[#allocation2]]  ;;  %v56_v0 = vld [vmem:[%s113_s0] sm:$0xf]   ;;  %v30_v7 = vld [vmem:[%s114_s1 + $0x8] sm:$0xff] }
   0x7   :  { %s54_s19 = sld [smem:[#allocation2 + $0x1]]  ;;  %v57_v1 = vunpack.c.0.s8 %v56_v0  ;;  %v58_v2 = vunpack.c.1.s8 %v56_v0  ;;  %v29_v5 = vld [vmem:[%s114_s1] sm:$0xff] }
   0x9   :  { %v38_v3 = vand.u32 255, %v57_v1  ;;  %v39_v4 = vand.u32 255, %v58_v2 }
   0xb   :  { %v40_v6 = vcvt.s32.f32 %v38_v3  ;;  %v41_v8 = vcvt.s32.f32 %v39_v4 }
   0xc   :  { %v42_v9 = vstv %s27_s16 }
   0xd   :  { %v31_v10 = vstv %s54_s19  ;;  %v43_v11 = vmul.f32 %v42_v9, %v40_v6  ;;  %v44_v12 = vmul.f32 %v42_v9, %v41_v8 }
   0xe   :  { %v32_v13 = vmul.f32 %v31_v10, %v29_v5  ;;  %v33_v14 = vmul.f32 %v31_v10, %v30_v7 }
  0x10   :  { %v45_v15 = vadd.f32 %v43_v11, %v32_v13  ;;  %v46_v16 = vadd.f32 %v44_v12, %v33_v14 }
  0x12   :  { %47 = vst [vmem:[%s116_s3] sm:$0xff] %v45_v15 }
  0x13   :  { %48 = vst [vmem:[%s116_s3 + $0x8] sm:$0xff] %v46_v16 }
  0x14   :  { %53 = vsyncpa [#allocation3], 1 }

</bundles_post_ra>
